<compile_context>
chip_gen: v7x
topology: tpu7x:2x2x1
jax: 0.10.0
libtpu: 0.0.40
codegen_flags: <defaults>
</compile_context>

<pallas_src>
import jax
import jax.numpy as jnp
from jax.experimental import pallas as pl
from jax.experimental.pallas import tpu as pltpu


def _round_up(x, m):
    return ((x + m - 1) // m) * m


def _double_dense_kernel(x_ref, w1_ref, b1_ref, w2_ref, b2_ref, w3_ref, b3_ref, o_ref):
    # x_ref : (TM, D)    f32 batch tile (streamed / multi-buffered).
    # w*_ref: bf16 weights, VMEM-resident (constant index_map, single-buffered).
    # b*_ref: (1, Hp)    f32 biases.
    # o_ref : (TM, Op)   f32, lane-dense (Op is a multiple of 128).
    x = x_ref[...].astype(jnp.bfloat16)      # f32 -> bf16 on-chip; VPU cast hides under MXU/DMA

    # dense1 + ReLU  (MXU bf16 inputs, f32 accumulation; elementwise kept in f32)
    h1 = jnp.dot(x, w1_ref[...], preferred_element_type=jnp.float32)
    h1 = jnp.maximum(h1 + b1_ref[...], 0.0)

    # dense2 + ReLU
    h2 = jnp.dot(h1.astype(jnp.bfloat16), w2_ref[...], preferred_element_type=jnp.float32)
    h2 = jnp.maximum(h2 + b2_ref[...], 0.0)

    # dense3 (no activation)
    out = jnp.dot(h2.astype(jnp.bfloat16), w3_ref[...], preferred_element_type=jnp.float32)
    o_ref[...] = (out + b3_ref[...]).astype(o_ref.dtype)


def double_dense(x_nchw, params, *, tm=None):
    """x_nchw: (B, C, H, W) float32.  params: dict of transposed f32 weights & biases."""
    B = x_nchw.shape[0]
    x2d = x_nchw.reshape(B, -1).astype(jnp.float32)      # glue: x.view(B, -1)
    D = x2d.shape[1]

    w1, b1 = params["w1"], params["b1"]                  # (D, H1),  (1, H1)
    w2, b2 = params["w2"], params["b2"]                  # (H1, H2), (1, H2)
    w3, b3 = params["w3"], params["b3"]                  # (H2, O),  (1, O)
    H1, H2, O = w1.shape[1], w2.shape[1], w3.shape[1]

    # --- lane-dense feature padding (zero padding is mathematically inert) -------------
    H1p = _round_up(H1, 128)
    H2p = _round_up(H2, 128)
    Op = _round_up(O, 128)

    w1_p = jnp.zeros((D, H1p), jnp.bfloat16).at[:, :H1].set(w1.astype(jnp.bfloat16))
    b1_p = jnp.zeros((1, H1p), jnp.float32).at[:, :H1].set(b1.astype(jnp.float32))
    w2_p = jnp.zeros((H1p, H2p), jnp.bfloat16).at[:H1, :H2].set(w2.astype(jnp.bfloat16))
    b2_p = jnp.zeros((1, H2p), jnp.float32).at[:, :H2].set(b2.astype(jnp.float32))
    w3_p = jnp.zeros((H2p, Op), jnp.bfloat16).at[:H2, :O].set(w3.astype(jnp.bfloat16))
    b3_p = jnp.zeros((1, Op), jnp.float32).at[:, :O].set(b3.astype(jnp.float32))

    # --- per-generation VMEM budget & batch tiling --------------------------------------
    try:
        vmem_cap = int(pltpu.get_tpu_info().vmem_capacity_bytes)
    except Exception:
        vmem_cap = 128 * 1024 * 1024
    usable_vmem = int(vmem_cap * 0.82)                   # ~105 MiB on v5e/v6e, ~52 MiB on v7x
    big_vmem = vmem_cap >= 96 * 1024 * 1024

    x_bufs = 3 if big_vmem else 2                        # deeper x buffering where VMEM allows
    resident = ((D * H1p + H1p * H2p + H2p * Op) * 2     # bf16 weights (single-buffered)
                + (H1p + H2p + Op) * 4)                  # f32 biases

    if tm is None:
        bytes_per_row = x_bufs * D * 4 + 2 * Op * 4      # streamed x tile + out tile, per row
        budget = max(usable_vmem - resident - (4 << 20), 1 << 20)
        tm_cap = max(8, min((budget // bytes_per_row) // 8 * 8, 1024 if big_vmem else 512))
        if B >= 256 and B <= 2 * tm_cap:
            tm = _round_up((B + 1) // 2, 8)              # >= 2 grid steps for v7x megacore
        elif B <= tm_cap:
            tm = B                                       # whole batch in one tile, no padding
        else:
            tm = tm_cap

    B_pad = _round_up(B, tm)
    if B_pad != B:                                       # pad only the ragged final tile
        x2d = jnp.concatenate([x2d, jnp.zeros((B_pad - B, D), jnp.float32)], axis=0)
    grid = (B_pad // tm,)

    def build_specs(use_pipeline_mode):
        if use_pipeline_mode:
            resident_kw = dict(pipeline_mode=pl.Buffered(1))     # single-buffer resident weights
            stream_kw = dict(pipeline_mode=pl.Buffered(x_bufs))  # deep-buffer streamed x
        else:
            resident_kw = {}
            stream_kw = {}
        in_specs = [
            pl.BlockSpec((tm, D), lambda i: (i, 0), **stream_kw),     # x tile: streamed per step
            pl.BlockSpec((D, H1p), lambda i: (0, 0), **resident_kw),  # weights/biases: fetched
            pl.BlockSpec((1, H1p), lambda i: (0, 0), **resident_kw),  # once, VMEM-resident
            pl.BlockSpec((H1p, H2p), lambda i: (0, 0), **resident_kw),
            pl.BlockSpec((1, H2p), lambda i: (0, 0), **resident_kw),
            pl.BlockSpec((H2p, Op), lambda i: (0, 0), **resident_kw),
            pl.BlockSpec((1, Op), lambda i: (0, 0), **resident_kw),
        ]
        out_specs = pl.BlockSpec((tm, Op), lambda i: (i, 0))
        return in_specs, out_specs

    # Advisory cost estimate for XLA's scheduler.
    flops = 2 * B_pad * (D * H1p + H1p * H2p + H2p * Op)
    bytes_accessed = (
        B_pad * D * 4                                    # x (f32, read once)
        + (D * H1p + H1p * H2p + H2p * Op) * 2           # bf16 weights
        + (H1p + H2p + Op) * 4                           # f32 biases
        + B_pad * Op * 4                                 # f32 output
    )
    cost = pl.CostEstimate(flops=flops, transcendentals=0, bytes_accessed=bytes_accessed)

    # Explicit VMEM budget (conservative: assume worst-case double-buffered weights so a
    # fallback to default buffering still fits).
    streamed = x_bufs * tm * D * 4 + 2 * tm * Op * 4
    vmem_need = 2 * resident + streamed
    vmem_limit = int(min(max(32 << 20, vmem_need * 3 // 2, vmem_need + (2 << 20)), usable_vmem))

    def run(use_pipeline_mode):
        in_specs, out_specs = build_specs(use_pipeline_mode)
        return pl.pallas_call(
            _double_dense_kernel,
            out_shape=jax.ShapeDtypeStruct((B_pad, Op), jnp.float32),
            grid=grid,
            in_specs=in_specs,
            out_specs=out_specs,
            compiler_params=pltpu.CompilerParams(
                dimension_semantics=("parallel",),        # megacore sharding on v7x
                vmem_limit_bytes=vmem_limit,
            ),
            cost_estimate=cost,
        )(x2d, w1_p, b1_p, w2_p, b2_p, w3_p, b3_p)

    try:
        out_pad = run(True)
    except Exception:
        # TODO(synk): pipeline_mode=pl.Buffered is unavailable on older JAX; fall back to
        # default double-buffering (functionally identical, slightly more VMEM).
        out_pad = run(False)

    return out_pad[:B, :O]


def init_params(key, in_features, hidden, out_channels):
    """Deterministic init mimicking nn.Linear's uniform(-1/sqrt(fan_in), 1/sqrt(fan_in)).
    Weights stored as (in, out) = transpose of PyTorch's (out, in)."""
    ks = jax.random.split(key, 6)

    def linear(kw, kb, fan_in, fan_out):
        bound = 1.0 / jnp.sqrt(fan_in)
        w = jax.random.uniform(kw, (fan_in, fan_out), jnp.float32, -bound, bound)
        b = jax.random.uniform(kb, (1, fan_out), jnp.float32, -bound, bound)
        return w, b

    w1, b1 = linear(ks[0], ks[1], in_features, hidden)
    w2, b2 = linear(ks[2], ks[3], hidden, hidden // 2)
    w3, b3 = linear(ks[4], ks[5], hidden // 2, out_channels)
    return {"w1": w1, "b1": b1, "w2": w2, "b2": b2, "w3": w3, "b3": b3}


def reference(x_nchw, params):
    x = x_nchw.reshape(x_nchw.shape[0], -1)
    h = jax.nn.relu(x @ params["w1"] + params["b1"])
    h = jax.nn.relu(h @ params["w2"] + params["b2"])
    return h @ params["w3"] + params["b3"]


if __name__ == "__main__":
    # Small shapes consistent with the module: x.view(B, -1) implies
    # in_channels == C*H*W of the input.
    B, C, H, W = 2, 4, 16, 16
    in_features = C * H * W          # 1024
    hidden = 32
    out_channels = 8

    key = jax.random.PRNGKey(0)
    k_x, k_p = jax.random.split(key)
    x = jax.random.normal(k_x, (B, C, H, W), jnp.float32)
    params = init_params(k_p, in_features, hidden, out_channels)

    out = jax.block_until_ready(double_dense(x, params))
    ref = reference(x, params)

    assert out.shape == (B, out_channels), out.shape
    # bf16 MXU inputs (f32 accumulation) vs a pure-f32 reference -> bf16-level tolerance.
    max_err = float(jnp.max(jnp.abs(out - ref)))
    assert jnp.allclose(out, ref, atol=2e-2, rtol=2e-2), max_err

    print("KERNEL_OK")
</pallas_src>

<mosaic_0001>
module attributes {stable_mosaic.version = 11 : i64} {
  func.func @_double_dense_kernel(%arg0: i32, %arg1: memref<2x1024xf32, #tpu.memory_space<vmem>>, %arg2: memref<1024x128xbf16, #tpu.memory_space<vmem>>, %arg3: memref<1x128xf32, #tpu.memory_space<vmem>>, %arg4: memref<128x128xbf16, #tpu.memory_space<vmem>>, %arg5: memref<1x128xf32, #tpu.memory_space<vmem>>, %arg6: memref<128x128xbf16, #tpu.memory_space<vmem>>, %arg7: memref<1x128xf32, #tpu.memory_space<vmem>>, %arg8: memref<2x128xf32, #tpu.memory_space<vmem>>) attributes {dimension_semantics = [#tpu.dimension_semantics<parallel>], iteration_bounds = array<i64: 1>, scalar_prefetch = 0 : i64, scratch_operands = 0 : i64, tpu.core_type = #tpu.core_type<tc>, window_params = [{transform_indices = @transform_0, window_bounds = array<i64: 2, 1024>}, {pipeline_mode = #tpu.pipeline_mode<synchronous>, transform_indices = @transform_1, window_bounds = array<i64: 1024, 128>}, {pipeline_mode = #tpu.pipeline_mode<synchronous>, transform_indices = @transform_2, window_bounds = array<i64: 1, 128>}, {pipeline_mode = #tpu.pipeline_mode<synchronous>, transform_indices = @transform_3, window_bounds = array<i64: 128, 128>}, {pipeline_mode = #tpu.pipeline_mode<synchronous>, transform_indices = @transform_4, window_bounds = array<i64: 1, 128>}, {pipeline_mode = #tpu.pipeline_mode<synchronous>, transform_indices = @transform_5, window_bounds = array<i64: 128, 128>}, {pipeline_mode = #tpu.pipeline_mode<synchronous>, transform_indices = @transform_6, window_bounds = array<i64: 1, 128>}, {transform_indices = @transform_7, window_bounds = array<i64: 2, 128>}]} {
    %c0 = arith.constant 0 : index
    %c0_0 = arith.constant 0 : index
    %0 = vector.load %arg1[%c0, %c0_0] : memref<2x1024xf32, #tpu.memory_space<vmem>>, vector<2x1024xf32>
    %1 = arith.truncf %0 : vector<2x1024xf32> to vector<2x1024xbf16>
    %c0_1 = arith.constant 0 : index
    %c0_2 = arith.constant 0 : index
    %2 = vector.load %arg2[%c0_1, %c0_2] : memref<1024x128xbf16, #tpu.memory_space<vmem>>, vector<1024x128xbf16>
    %cst = arith.constant dense<0.000000e+00> : vector<2x128xf32>
    %3 = tpu.matmul %1, %2, %cst {dimension_numbers = #tpu.dot_dimension_numbers<[1], [0], [0], [1], [0, 0, 1, 1], [], []>} : vector<2x1024xbf16>, vector<1024x128xbf16>, vector<2x128xf32> -> vector<2x128xf32>
    %c0_3 = arith.constant 0 : index
    %c0_4 = arith.constant 0 : index
    %4 = vector.load %arg3[%c0_3, %c0_4] : memref<1x128xf32, #tpu.memory_space<vmem>>, vector<1x128xf32>
    %5 = vector.broadcast %4 : vector<1x128xf32> to vector<2x128xf32>
    %6 = arith.addf %3, %5 : vector<2x128xf32>
    %cst_5 = arith.constant 0.000000e+00 : f32
    %7 = vector.broadcast %cst_5 : f32 to vector<2x128xf32>
    %8 = arith.maximumf %6, %7 : vector<2x128xf32>
    %9 = arith.truncf %8 : vector<2x128xf32> to vector<2x128xbf16>
    %c0_6 = arith.constant 0 : index
    %c0_7 = arith.constant 0 : index
    %10 = vector.load %arg4[%c0_6, %c0_7] : memref<128x128xbf16, #tpu.memory_space<vmem>>, vector<128x128xbf16>
    %cst_8 = arith.constant dense<0.000000e+00> : vector<2x128xf32>
    %11 = tpu.matmul %9, %10, %cst_8 {dimension_numbers = #tpu.dot_dimension_numbers<[1], [0], [0], [1], [0, 0, 1, 1], [], []>} : vector<2x128xbf16>, vector<128x128xbf16>, vector<2x128xf32> -> vector<2x128xf32>
    %c0_9 = arith.constant 0 : index
    %c0_10 = arith.constant 0 : index
    %12 = vector.load %arg5[%c0_9, %c0_10] : memref<1x128xf32, #tpu.memory_space<vmem>>, vector<1x128xf32>
    %13 = vector.broadcast %12 : vector<1x128xf32> to vector<2x128xf32>
    %14 = arith.addf %11, %13 : vector<2x128xf32>
    %cst_11 = arith.constant 0.000000e+00 : f32
    %15 = vector.broadcast %cst_11 : f32 to vector<2x128xf32>
    %16 = arith.maximumf %14, %15 : vector<2x128xf32>
    %17 = arith.truncf %16 : vector<2x128xf32> to vector<2x128xbf16>
    %c0_12 = arith.constant 0 : index
    %c0_13 = arith.constant 0 : index
    %18 = vector.load %arg6[%c0_12, %c0_13] : memref<128x128xbf16, #tpu.memory_space<vmem>>, vector<128x128xbf16>
    %cst_14 = arith.constant dense<0.000000e+00> : vector<2x128xf32>
    %19 = tpu.matmul %17, %18, %cst_14 {dimension_numbers = #tpu.dot_dimension_numbers<[1], [0], [0], [1], [0, 0, 1, 1], [], []>} : vector<2x128xbf16>, vector<128x128xbf16>, vector<2x128xf32> -> vector<2x128xf32>
    %c0_15 = arith.constant 0 : index
    %c0_16 = arith.constant 0 : index
    %20 = vector.load %arg7[%c0_15, %c0_16] : memref<1x128xf32, #tpu.memory_space<vmem>>, vector<1x128xf32>
    %21 = vector.broadcast %20 : vector<1x128xf32> to vector<2x128xf32>
    %22 = arith.addf %19, %21 : vector<2x128xf32>
    %c0_17 = arith.constant 0 : index
    %c0_18 = arith.constant 0 : index
    %23 = vector.load %arg8[%c0_17, %c0_18] : memref<2x128xf32, #tpu.memory_space<vmem>>, vector<2x128xf32>
    tpu.vector_store %arg8[%c0_17, %c0_18], %22 {strides = array<i32>} : memref<2x128xf32, #tpu.memory_space<vmem>>, vector<2x128xf32>,
    return
  }
  func.func @transform_0(%arg0: i32) -> (i32, i32) {
    %c0_i32 = arith.constant 0 : i32
    %c0_i32_0 = arith.constant 0 : i32
    return %arg0, %c0_i32 : i32, i32
  }
  func.func @transform_1(%arg0: i32) -> (i32, i32) {
    %c0_i32 = arith.constant 0 : i32
    %c0_i32_0 = arith.constant 0 : i32
    %c0_i32_1 = arith.constant 0 : i32
    return %c0_i32, %c0_i32_0 : i32, i32
  }
  func.func @transform_2(%arg0: i32) -> (i32, i32) {
    %c0_i32 = arith.constant 0 : i32
    %c0_i32_0 = arith.constant 0 : i32
    %c0_i32_1 = arith.constant 0 : i32
    return %c0_i32, %c0_i32_0 : i32, i32
  }
  func.func @transform_3(%arg0: i32) -> (i32, i32) {
    %c0_i32 = arith.constant 0 : i32
    %c0_i32_0 = arith.constant 0 : i32
    %c0_i32_1 = arith.constant 0 : i32
    return %c0_i32, %c0_i32_0 : i32, i32
  }
  func.func @transform_4(%arg0: i32) -> (i32, i32) {
    %c0_i32 = arith.constant 0 : i32
    %c0_i32_0 = arith.constant 0 : i32
    %c0_i32_1 = arith.constant 0 : i32
    return %c0_i32, %c0_i32_0 : i32, i32
  }
  func.func @transform_5(%arg0: i32) -> (i32, i32) {
    %c0_i32 = arith.constant 0 : i32
    %c0_i32_0 = arith.constant 0 : i32
    %c0_i32_1 = arith.constant 0 : i32
    return %c0_i32, %c0_i32_0 : i32, i32
  }
  func.func @transform_6(%arg0: i32) -> (i32, i32) {
    %c0_i32 = arith.constant 0 : i32
    %c0_i32_0 = arith.constant 0 : i32
    %c0_i32_1 = arith.constant 0 : i32
    return %c0_i32, %c0_i32_0 : i32, i32
  }
  func.func @transform_7(%arg0: i32) -> (i32, i32) {
    %c0_i32 = arith.constant 0 : i32
    %c0_i32_0 = arith.constant 0 : i32
    return %arg0, %c0_i32 : i32, i32
  }
}

</mosaic_0001>

<bundles_post_ra>
// kernel: tpu_custom_call.1
= control target key start
LH: loop header
LB: loop body
LE: loop exit
PB: predicated region body
PF: predicated region fallthrough
CT: control target
= control target key end

     0   :  { %12 = vsyncpa [#allocation3], 0  ;;  %s1649_s0 = inlined_call_operand.hbm [shape: f32[2,1024], index: 0, kind: input, shape index: {}]   ;;  %s1650_s1 = inlined_call_operand.hbm [shape: bf16[1024,128], index: 1, kind: input, shape index: {}]   ;;  %s1651_s2 = inlined_call_operand.vmem [shape: f32[1,128], index: 2, kind: input, shape index: {}]   ;;  %s1652_s3 = inlined_call_operand.hbm [shape: bf16[128,128], index: 3, kind: input, shape index: {}]   ;;  %s1653_s4 = inlined_call_operand.vmem [shape: f32[1,128], index: 4, kind: input, shape index: {}]   ;;  %s1654_s5 = inlined_call_operand.hbm [shape: bf16[128,128], index: 5, kind: input, shape index: {}]   ;;  %s1655_s6 = inlined_call_operand.vmem [shape: f32[1,128], index: 6, kind: input, shape index: {}]   ;;  %s1656_s7 = inlined_call_operand.hbm [shape: f32[2,128], index: 7, kind: output, shape index: {}]  }
   0x1   :  { %13 = vsyncpa [#allocation6], 0 }
   0x2   :  { %14 = vsyncpa [#allocation9], 0 }
   0x3   :  { %15 = vsyncpa [#allocation4], 0  ;;  %s1497_s24 = smov [#allocation5]   ;;  %s1379_s28 = scalar_lea.hbm %s1650_s1, 8192 }
   0x4   :  { %s31_s25 = sshll.u32 %s1497_s24, 4  ;;  %p1380_p0 = scmp.ne.s32.totalorder %s1650_s1, %s1379_s28  ;;  %s32_s25 = int_to_ptr.vmem [resolvable:$true] %s31_s25 }
   0x5   :  { %p1383_p1 = scmp.lt.u32.totalorder %s1379_s28, %s1650_s1 }
   0x7   :  { %p1385_p2 = pnand %p1383_p1, %p1380_p0 }
   0x9   :  { %1388 = shalt.err (!%p1385_p2)
}
   0xa   :  { %s1389_s10 = scalar_lea.vmem %s32_s25, 8192  ;;  %p1394_p4 = scmp.lt.s32.totalorder %s32_s25, %s32_s25 }
   0xb   :  { %p1390_p3 = scmp.ne.s32.totalorder %s32_s25, %s1389_s10  ;;  %p1395_p5 = scmp.lt.s32.totalorder %s1389_s10, %s1389_s10 }
   0xd   :  { %p1396_p6 = por %p1395_p5, %p1394_p4 }
   0xf   :  { %p1397_p7 = pnand %p1396_p6, %p1390_p3 }
  0x11   :  { %1400 = shalt.err (!%p1397_p7)
}
  0x12   :  { %s1498_s11 = smov 64   ;;  %s1499_s12 = smov 4  }
  0x13   :  { %37 = dma.hbm_to_vmem [thread:$0]  %s1650_s1, 8192, %s32_s25, [#allocation6], %s1498_s11, %s1498_s11, %s1499_s12  }
  0x14   :  { %s1500_s15 = smov [#allocation2]   ;;  %s1501_s17 = smov [#allocation7]  }
  0x15   :  { %s22_s16 = sshll.u32 %s1500_s15, 4  ;;  %s45_s18 = sshll.u32 %s1501_s17, 4  ;;  %s23_s16 = int_to_ptr.vmem [resolvable:$true] %s22_s16  ;;  %s46_s18 = int_to_ptr.vmem [resolvable:$true] %s45_s18 }
  0x16   :  { %s1401_s21 = scalar_lea.hbm %s1649_s0, 256 }
  0x17   :  { %p1402_p8 = scmp.ne.s32.totalorder %s1649_s0, %s1401_s21  ;;  %p1405_p9 = scmp.lt.u32.totalorder %s1401_s21, %s1649_s0 }
  0x19   :  { %p1407_p10 = pnand %p1405_p9, %p1402_p8 }
  0x1b   :  { %1410 = shalt.err (!%p1407_p10)
}
  0x1c   :  { %s1411_s1 = scalar_lea.vmem %s23_s16, 256  ;;  %p1416_p12 = scmp.lt.s32.totalorder %s23_s16, %s23_s16 }
  0x1d   :  { %p1412_p11 = scmp.ne.s32.totalorder %s23_s16, %s1411_s1  ;;  %p1417_p13 = scmp.lt.s32.totalorder %s1411_s1, %s1411_s1 }
  0x1f   :  { %p1418_p0 = por %p1417_p13, %p1416_p12 }
  0x21   :  { %p1419_p1 = pnand %p1418_p0, %p1412_p11 }
  0x23   :  { %1422 = shalt.err (!%p1419_p1)
}
  0x24   :  { %25 = dma.hbm_to_vmem [thread:$0]  %s1649_s0, 256, %s23_s16, [#allocation3]  }
  0x25   :  { %s1423_s30 = scalar_lea.hbm %s1652_s3, 1024 }
  0x26   :  { %p1424_p2 = scmp.ne.s32.totalorder %s1652_s3, %s1423_s30  ;;  %p1427_p3 = scmp.lt.u32.totalorder %s1423_s30, %s1652_s3 }
  0x28   :  { %p1429_p4 = pnand %p1427_p3, %p1424_p2 }
  0x2a   :  { %1432 = shalt.err (!%p1429_p4)
}
  0x2b   :  { %s1433_s14 = scalar_lea.vmem %s46_s18, 1024  ;;  %p1438_p6 = scmp.lt.s32.totalorder %s46_s18, %s46_s18 }
  0x2c   :  { %p1434_p5 = scmp.ne.s32.totalorder %s46_s18, %s1433_s14  ;;  %p1439_p7 = scmp.lt.s32.totalorder %s1433_s14, %s1433_s14 }
  0x2e   :  { %p1440_p8 = por %p1439_p7, %p1438_p6 }
  0x30   :  { %p1441_p9 = pnand %p1440_p8, %p1434_p5 }
  0x32   :  { %1444 = shalt.err (!%p1441_p9)
}
  0x33   :  { %51 = dma.hbm_to_vmem [thread:$0]  %s1652_s3, 1024, %s46_s18, [#allocation6], %s1498_s11, %s1498_s11, %s1499_s12  }
  0x34   :  { %s1502_s16 = smov [#allocation8]   ;;  %s1445_s21 = scalar_lea.hbm %s1654_s5, 1024 }
  0x35   :  { %s59_s17 = sshll.u32 %s1502_s16, 4  ;;  %p1446_p10 = scmp.ne.s32.totalorder %s1654_s5, %s1445_s21  ;;  %s60_s17 = int_to_ptr.vmem [resolvable:$true] %s59_s17 }
  0x36   :  { %p1449_p11 = scmp.lt.u32.totalorder %s1445_s21, %s1654_s5 }
  0x38   :  { %p1451_p12 = pnand %p1449_p11, %p1446_p10 }
  0x3a   :  { %1454 = shalt.err (!%p1451_p12)
}
  0x3b   :  { %s1455_s1 = scalar_lea.vmem %s60_s17, 1024  ;;  %p1460_p0 = scmp.lt.s32.totalorder %s60_s17, %s60_s17 }
  0x3c   :  { %p1456_p13 = scmp.ne.s32.totalorder %s60_s17, %s1455_s1  ;;  %p1461_p1 = scmp.lt.s32.totalorder %s1455_s1, %s1455_s1 }
  0x3e   :  { %p1462_p2 = por %p1461_p1, %p1460_p0 }
  0x40   :  { %p1463_p3 = pnand %p1462_p2, %p1456_p13 }
  0x42   :  { %1466 = shalt.err (!%p1463_p3)
}
  0x43   :  { %65 = dma.hbm_to_vmem [thread:$0]  %s1654_s5, 1024, %s60_s17, [#allocation9], %s1498_s11, %s1498_s11, %s1499_s12  }
  0x44   :  { %1489 = dma.done.wait [#allocation3], 256  }
  0x45   :  { %1490 = vsyncadd [#allocation3], 4294967040 }
  0x46   :  { %1491 = dma.done.wait [#allocation6], 9216  }
  0x47   :  { %1492 = vsyncadd [#allocation6], 4294958080 }
  0x48   :  { %1493 = dma.done.wait [#allocation9], 1024  }
  0x49   :  { %1494 = vsyncadd [#allocation9], 4294966272  ;;  %v1297_v0 = vld [vmem:[#allocation5 + $0x40] sm:$0xff]   ;;  %v1301_v4 = vld [vmem:[#allocation5 + $0x48] sm:$0xff]   ;;  %v1503_v22 = vmov 1983009808   ;;  %v89_v24 = vlaneseq }
  0x4a   :  { %v1298_v1 = vld [vmem:[#allocation5 + $0xc0] sm:$0xff]   ;;  %1141 = vmatprep.subr.bf16.mxu0 %v1297_v0  ;;  %v1302_v5 = vld [vmem:[#allocation5 + $0xc8] sm:$0xff]   ;;  %v1305_v8 = vld [vmem:[#allocation5 + $0x50] sm:$0xff]   ;;  %v87_v23 = vunpack.c.l.s4 %v1503_v22  ;;  %vm1505_vm0 = vmmov 0   ;;  %s1506_s28 = smov [#allocation10]  }
  0x4b   :  { %v1299_v2 = vld [vmem:[#allocation5] sm:$0xff]   ;;  %1163 = vmatprep.subr.bf16.mxu1 %v1298_v1  ;;  %v1303_v6 = vld [vmem:[#allocation5 + $0x8] sm:$0xff]   ;;  %v1306_v9 = vld [vmem:[#allocation5 + $0xd0] sm:$0xff]   ;;  %v90_v30 = vshrl.u32 %v89_v24, 7  ;;  %s1047_s29 = sshll.u32 %s1506_s28, 4  ;;  %s1048_s29 = int_to_ptr.vmem [resolvable:$true] %s1047_s29 }
  0x4c   :  { %v1300_v3 = vld [vmem:[#allocation5 + $0x80] sm:$0xff]   ;;  %1142 = vmatpush3.bf16.msra.mxu0 %v1299_v2  ;;  %v1304_v7 = vld [vmem:[#allocation5 + $0x88] sm:$0xff]   ;;  %v1307_v10 = vld [vmem:[#allocation5 + $0x10] sm:$0xff]   ;;  %v88_v29 = vunpack.c.0.s8 %v87_v23  ;;  %p1472_p5 = scmp.lt.s32.totalorder %s1048_s29, %s1048_s29 }
  0x4d   :  { %1164 = vmatpush3.bf16.msra.mxu1 %v1300_v3  ;;  %1143 = vmatprep.subr.bf16.mxu0 %v1301_v4  ;;  %v1308_v11 = vld [vmem:[#allocation5 + $0x90] sm:$0xff]   ;;  %v1309_v12 = vld [vmem:[#allocation5 + $0x58] sm:$0xff]   ;;  %v1313_v16 = vld [vmem:[#allocation5 + $0x60] sm:$0xff]  }
  0x4e   :  { %1165 = vmatprep.subr.bf16.mxu1 %v1302_v5  ;;  %v1310_v13 = vld [vmem:[#allocation5 + $0xd8] sm:$0xff]   ;;  %v1314_v17 = vld [vmem:[#allocation5 + $0xe0] sm:$0xff]   ;;  %v1317_v20 = vld [vmem:[#allocation5 + $0x68] sm:$0xff]   ;;  %v1604_v35 = vsub.s32 %v88_v29, %v90_v30 }
  0x4f   :  { %v1311_v14 = vld [vmem:[#allocation5 + $0x18] sm:$0xff]   ;;  %v1315_v18 = vld [vmem:[#allocation5 + $0x20] sm:$0xff]   ;;  %v1318_v21 = vld [vmem:[#allocation5 + $0xe8] sm:$0xff]  }
  0x50   :  { %1144 = vmatpush3.bf16.msra.mxu0 %v1303_v6  ;;  %v1312_v15 = vld [vmem:[#allocation5 + $0x98] sm:$0xff]   ;;  %v1316_v19 = vld [vmem:[#allocation5 + $0xa0] sm:$0xff]   ;;  %v1319_v25 = vld [vmem:[#allocation5 + $0x28] sm:$0xff]  }
  0x51   :  { %1166 = vmatpush3.bf16.msra.mxu1 %v1304_v7  ;;  %1145 = vmatprep.subr.bf16.mxu0 %v1305_v8  ;;  %v1320_v26 = vld [vmem:[#allocation5 + $0xa8] sm:$0xff]   ;;  %v1321_v27 = vld [vmem:[#allocation5 + $0x70] sm:$0xff]   ;;  %v1325_v33 = vld [vmem:[#allocation5 + $0x78] sm:$0xff]  }
  0x52   :  { %1167 = vmatprep.subr.bf16.mxu1 %v1306_v9  ;;  %v1322_v28 = vld [vmem:[#allocation5 + $0xf0] sm:$0xff]   ;;  %v1326_v34 = vld [vmem:[#allocation5 + $0xf8] sm:$0xff]   ;;  %v1330_v41 = vld [vmem:[#allocation5 + $0x140] sm:$0xff]  }
  0x53   :  { %v1323_v31 = vld [vmem:[#allocation5 + $0x30] sm:$0xff]   ;;  %v1327_v36 = vld [vmem:[#allocation5 + $0x38] sm:$0xff]   ;;  %v1331_v42 = vld [vmem:[#allocation5 + $0x1c0] sm:$0xff]  }
  0x54   :  { %1146 = vmatpush3.bf16.msra.mxu0 %v1307_v10  ;;  %v1324_v32 = vld [vmem:[#allocation5 + $0xb0] sm:$0xff]   ;;  %v1328_v37 = vld [vmem:[#allocation5 + $0xb8] sm:$0xff]   ;;  %v1332_v46 = vld [vmem:[#allocation5 + $0x100] sm:$0xff]  }
  0x55   :  { %1168 = vmatpush3.bf16.msra.mxu1 %v1308_v11  ;;  %1147 = vmatprep.subr.bf16.mxu0 %v1309_v12  ;;  %v81_v38 = vld [vmem:[#allocation2] sm:$0xff]  ;;  %v1333_v49 = vld [vmem:[#allocation5 + $0x180] sm:$0xff]   ;;  %v1334_v51 = vld [vmem:[#allocation5 + $0x148] sm:$0xff]  }
  0x56   :  { %1169 = vmatprep.subr.bf16.mxu1 %v1310_v13  ;;  %v92_v39 = vrot.slane %v81_v38, %v1604_v35  ;;  %v85_v40 = vcombine.high %v81_v38, %v81_v38  ;;  %v1335_v53 = vld [vmem:[#allocation5 + $0x1c8] sm:$0xff]   ;;  %v1338_v56 = vld [vmem:[#allocation5 + $0x150] sm:$0xff]   ;;  %v1342_v60 = vld [vmem:[#allocation5 + $0x158] sm:$0xff]  }
  0x57   :  { %v1336_v54 = vld [vmem:[#allocation5 + $0x108] sm:$0xff]   ;;  %v1339_v57 = vld [vmem:[#allocation5 + $0x1d0] sm:$0xff]   ;;  %v1343_v61 = vld [vmem:[#allocation5 + $0x1d8] sm:$0xff]  }
  0x58   :  { %1148 = vmatpush3.bf16.msra.mxu0 %v1311_v14  ;;  %v100_v43 = vcombine.high %v92_v39, %v92_v39  ;;  %v99_v44 = vrot.slane %v85_v40, %v1604_v35  ;;  %v127_v45 = vpack.c.bf16 %v92_v39, %v92_v39  ;;  %v1337_v55 = vld [vmem:[#allocation5 + $0x188] sm:$0xff]   ;;  %v1340_v58 = vld [vmem:[#allocation5 + $0x110] sm:$0xff]   ;;  %v1344_v62 = vld [vmem:[#allocation5 + $0x118] sm:$0xff]  }
  0x59   :  { %1170 = vmatpush3.bf16.msra.mxu1 %v1312_v15  ;;  %1149 = vmatprep.subr.bf16.mxu0 %v1313_v16  ;;  %v1341_v59 = vld [vmem:[#allocation5 + $0x190] sm:$0xff]   ;;  %v1345_v63 = vld [vmem:[#allocation5 + $0x198] sm:$0xff]   ;;  %v1346_v0 = vld [vmem:[#allocation5 + $0x160] sm:$0xff]  }
  0x5a   :  { %1171 = vmatprep.subr.bf16.mxu1 %v1314_v17  ;;  %v128_v47 = vpack.c.bf16 %v100_v43, %v100_v43  ;;  %v101_v48 = vcombine.high %v99_v44, %v99_v44  ;;  %v129_v50 = vpack.c.bf16 %v99_v44, %v99_v44  ;;  %v1347_v1 = vld [vmem:[#allocation5 + $0x1e0] sm:$0xff]   ;;  %v1350_v4 = vld [vmem:[#allocation5 + $0x168] sm:$0xff]   ;;  %v1354_v8 = vld [vmem:[#allocation5 + $0x170] sm:$0xff]  }
  0x5b   :  { %v1348_v2 = vld [vmem:[#allocation5 + $0x120] sm:$0xff]   ;;  %v1351_v5 = vld [vmem:[#allocation5 + $0x1e8] sm:$0xff]   ;;  %v1355_v9 = vld [vmem:[#allocation5 + $0x1f0] sm:$0xff]  }
  0x5c   :  { %1150 = vmatpush3.bf16.msra.mxu0 %v1315_v18  ;;  %686 = vmatprep.mubr.bf16.mxu0 %v128_v47  ;;  %v130_v52 = vpack.c.bf16 %v101_v48, %v101_v48  ;;  %v1349_v3 = vld [vmem:[#allocation5 + $0x1a0] sm:$0xff]   ;;  %v1352_v6 = vld [vmem:[#allocation5 + $0x128] sm:$0xff]   ;;  %v1356_v10 = vld [vmem:[#allocation5 + $0x130] sm:$0xff]  }
  0x5d   :  { %1172 = vmatpush3.bf16.msra.mxu1 %v1316_v19  ;;  %1151 = vmatprep.subr.bf16.mxu0 %v1317_v20  ;;  %v1353_v7 = vld [vmem:[#allocation5 + $0x1a8] sm:$0xff]   ;;  %v1357_v11 = vld [vmem:[#allocation5 + $0x1b0] sm:$0xff]   ;;  %v1358_v12 = vld [vmem:[#allocation5 + $0x178] sm:$0xff]  }
  0x5e   :  { %1173 = vmatprep.subr.bf16.mxu1 %v1318_v21  ;;  %726 = vmatprep.mubr.bf16.mxu1 %v130_v52  ;;  %v1359_v13 = vld [vmem:[#allocation5 + $0x1f8] sm:$0xff]   ;;  %v1365_v29 = vld [vmem:[#allocation7 + $0x10] sm:$0xff]   ;;  %v1375_v39 = vld [vmem:[#allocation8 + $0x20] sm:$0xff]  }
  0x5f   :  { %v1360_v14 = vld [vmem:[#allocation5 + $0x138] sm:$0xff]   ;;  %v1376_v40 = vld [vmem:[#allocation8 + $0x28] sm:$0xff]  }
  0x60   :  { %1152 = vmatpush3.bf16.msra.mxu0 %v1319_v25  ;;  %v82_v15 = vld [vmem:[#allocation2 + $0x8] sm:$0xff] }
  0x61   :  { %1174 = vmatpush3.bf16.msra.mxu1 %v1320_v26  ;;  %1153 = vmatprep.subr.bf16.mxu0 %v1321_v27  ;;  %v1361_v16 = vld [vmem:[#allocation5 + $0x1b8] sm:$0xff]   ;;  %v109_v17 = vrot.slane %v82_v15, %v1604_v35  ;;  %v102_v18 = vcombine.high %v82_v15, %v82_v15  ;;  %v1363_v26 = vld [vmem:[#allocation7] sm:$0xff]   ;;  %v1504_v27 = vmov 0.0  }
  0x62   :  { %1175 = vmatprep.subr.bf16.mxu1 %v1322_v28  ;;  %v1364_v28 = vld [vmem:[#allocation7 + $0x8] sm:$0xff]   ;;  %v1366_v30 = vld [vmem:[#allocation7 + $0x18] sm:$0xff]  }
  0x63   :  { %v117_v19 = vcombine.high %v109_v17, %v109_v17  ;;  %v116_v20 = vrot.slane %v102_v18, %v1604_v35  ;;  %v131_v21 = vpack.c.bf16 %v109_v17, %v109_v17  ;;  %v1371_v35 = vld [vmem:[#allocation8] sm:$0xff]   ;;  %v1374_v38 = vld [vmem:[#allocation8 + $0x18] sm:$0xff]  }
  0x64   :  { %1154 = vmatpush3.bf16.msra.mxu0 %v1323_v31  ;;  %v1367_v31 = vld [vmem:[#allocation7 + $0x20] sm:$0xff]  }
  0x65   :  { %1176 = vmatpush3.bf16.msra.mxu1 %v1324_v32  ;;  %1155 = vmatprep.subr.bf16.mxu0 %v1325_v33  ;;  %v132_v22 = vpack.c.bf16 %v117_v19, %v117_v19  ;;  %v118_v23 = vcombine.high %v116_v20, %v116_v20  ;;  %v133_v24 = vpack.c.bf16 %v116_v20, %v116_v20  ;;  %v1368_v32 = vld [vmem:[#allocation7 + $0x28] sm:$0xff]   ;;  %v1369_v33 = vld [vmem:[#allocation7 + $0x30] sm:$0xff]  }
  0x66   :  { %1177 = vmatprep.subr.bf16.mxu1 %v1326_v34  ;;  %v1370_v34 = vld [vmem:[#allocation7 + $0x38] sm:$0xff]  }
  0x67   :  { %v134_v25 = vpack.c.bf16 %v118_v23, %v118_v23 }
  0x68   :  { %1156 = vmatpush3.bf16.msra.mxu0 %v1327_v36  ;;  %v1372_v36 = vld [vmem:[#allocation8 + $0x8] sm:$0xff]  }
  0x69   :  { %1178 = vmatpush3.bf16.msra.mxu1 %v1328_v37  ;;  %1185 = vmatprep.subr.bf16.mxu0 %v1330_v41  ;;  %v1373_v37 = vld [vmem:[#allocation8 + $0x10] sm:$0xff]  }
  0x6a   :  { %1207 = vmatprep.subr.bf16.mxu1 %v1331_v42  ;;  %v1058_v42 = vld [vmem:[%s1651_s2] ss:$0 sm:$0xff] }
  0x6b   :  { %687 = vmatmul.mubr.bf16.vlgmr.msra.gmra.mrb[0].mxu0 %v127_v45 }
  0x6c   :  { %1186 = vmatpush3.bf16.msra.mxu0 %v1332_v46  ;;  %727 = vmatmul.mubr.bf16.vlgmr.msra.gmra.mrb[0].mxu1 %v129_v50 }
  0x6d   :  { %1187 = vmatprep.subr.bf16.mxu0 %v1334_v51  ;;  %1208 = vmatpush3.bf16.msra.mxu1 %v1333_v49 }
  0x6e   :  { %1209 = vmatprep.subr.bf16.mxu1 %v1335_v53  ;;  %766 = vmatprep.mubr.bf16.mxu0 %v132_v22 }
  0x6f   :  { %806 = vmatprep.mubr.bf16.mxu1 %v134_v25 }
  0x70   :  { %1188 = vmatpush3.bf16.msra.mxu0 %v1336_v54 }
  0x71   :  { %1189 = vmatprep.subr.bf16.mxu0 %v1338_v56  ;;  %1210 = vmatpush3.bf16.msra.mxu1 %v1337_v55 }
  0x72   :  { %1211 = vmatprep.subr.bf16.mxu1 %v1339_v57 }
  0x74   :  { %1190 = vmatpush3.bf16.msra.mxu0 %v1340_v58 }
  0x75   :  { %1191 = vmatprep.subr.bf16.mxu0 %v1342_v60  ;;  %1212 = vmatpush3.bf16.msra.mxu1 %v1341_v59 }
  0x76   :  { %1213 = vmatprep.subr.bf16.mxu1 %v1343_v61 }
  0x78   :  { %1192 = vmatpush3.bf16.msra.mxu0 %v1344_v62 }
  0x79   :  { %1193 = vmatprep.subr.bf16.mxu0 %v1346_v0  ;;  %1214 = vmatpush3.bf16.msra.mxu1 %v1345_v63 }
  0x7a   :  { %1215 = vmatprep.subr.bf16.mxu1 %v1347_v1 }
  0x7c   :  { %1194 = vmatpush3.bf16.msra.mxu0 %v1348_v2 }
  0x7d   :  { %1195 = vmatprep.subr.bf16.mxu0 %v1350_v4  ;;  %1216 = vmatpush3.bf16.msra.mxu1 %v1349_v3  ;;  %v1377_v4 = vld [vmem:[#allocation8 + $0x30] sm:$0xff]  }
  0x7e   :  { %1217 = vmatprep.subr.bf16.mxu1 %v1351_v5  ;;  %v1378_v5 = vld [vmem:[#allocation8 + $0x38] sm:$0xff]  }
  0x80   :  { %1196 = vmatpush3.bf16.msra.mxu0 %v1352_v6  ;;  %v1123_v6 = vld [vmem:[%s1653_s4] ss:$0 sm:$0xff]  ;;  %s1467_s4 = scalar_lea.vmem %s1048_s29, 32 }
  0x81   :  { %1197 = vmatprep.subr.bf16.mxu0 %v1354_v8  ;;  %1218 = vmatpush3.bf16.msra.mxu1 %v1353_v7  ;;  %p1468_p4 = scmp.ne.s32.totalorder %s1048_s29, %s1467_s4  ;;  %p1473_p6 = scmp.lt.s32.totalorder %s1467_s4, %s1467_s4 }
  0x82   :  { %1219 = vmatprep.subr.bf16.mxu1 %v1355_v9 }
  0x83   :  { %p1474_p7 = por %p1473_p6, %p1472_p5 }
  0x84   :  { %1198 = vmatpush3.bf16.msra.mxu0 %v1356_v10 }
  0x85   :  { %1199 = vmatprep.subr.bf16.mxu0 %v1358_v12  ;;  %1220 = vmatpush3.bf16.msra.mxu1 %v1357_v11  ;;  %p1475_p8 = pnand %p1474_p7, %p1468_p4 }
  0x86   :  { %1221 = vmatprep.subr.bf16.mxu1 %v1359_v13 }
  0x88   :  { %1200 = vmatpush3.bf16.msra.mxu0 %v1360_v14  ;;  %v1132_v14 = vld [vmem:[%s1655_s6] ss:$0 sm:$0xff] }
  0x89   :  { %1222 = vmatpush3.bf16.msra.mxu1 %v1361_v16  ;;  %1247 = vmatprep.subr.bf16.mxu0 %v1504_v27 }
  0x8a   :  { %1267 = vmatprep.subr.bf16.mxu1 %v1504_v27 }
  0x8b   :  { %767 = vmatmul.mubr.bf16.vlgmr.msra.gmra.mrb[4].mxu0 %v131_v21 }
  0x8c   :  { %807 = vmatmul.mubr.bf16.vlgmr.msra.gmra.mrb[4].mxu1 %v133_v24  ;;  %1248 = vmatpush3.bf16.msra.mxu0 %v1363_v26 }
  0x8d   :  { %1249 = vmatprep.subr.bf16.mxu0 %v1504_v27  ;;  %1263 = vmatprep.mubr.msk.bf16.mxu0 %vm1505_vm0, %v1504_v27 }
  0x8e   :  { %1283 = vmatprep.mubr.msk.bf16.mxu1 %vm1505_vm0, %v1504_v27  ;;  %1268 = vmatpush3.bf16.msra.mxu1 %v1371_v35 }
  0x8f   :  { %1269 = vmatprep.subr.bf16.mxu1 %v1504_v27 }
  0x90   :  { %1250 = vmatpush3.bf16.msra.mxu0 %v1364_v28 }
  0x91   :  { %1251 = vmatprep.subr.bf16.mxu0 %v1504_v27 }
  0x92   :  { %1270 = vmatpush3.bf16.msra.mxu1 %v1372_v36 }
  0x93   :  { %1271 = vmatprep.subr.bf16.mxu1 %v1504_v27 }
  0x94   :  { %1252 = vmatpush3.bf16.msra.mxu0 %v1365_v29 }
  0x95   :  { %1253 = vmatprep.subr.bf16.mxu0 %v1504_v27 }
  0x96   :  { %1272 = vmatpush3.bf16.msra.mxu1 %v1373_v37 }
  0x97   :  { %1273 = vmatprep.subr.bf16.mxu1 %v1504_v27 }
  0x98   :  { %1254 = vmatpush3.bf16.msra.mxu0 %v1366_v30 }
  0x99   :  { %1255 = vmatprep.subr.bf16.mxu0 %v1504_v27 }
  0x9a   :  { %1274 = vmatpush3.bf16.msra.mxu1 %v1374_v38 }
  0x9b   :  { %1275 = vmatprep.subr.bf16.mxu1 %v1504_v27 }
  0x9c   :  { %1256 = vmatpush3.bf16.msra.mxu0 %v1367_v31 }
  0x9d   :  { %1257 = vmatprep.subr.bf16.mxu0 %v1504_v27 }
  0x9e   :  { %1276 = vmatpush3.bf16.msra.mxu1 %v1375_v39 }
  0x9f   :  { %1277 = vmatprep.subr.bf16.mxu1 %v1504_v27 }
  0xa0   :  { %1258 = vmatpush3.bf16.msra.mxu0 %v1368_v32 }
  0xa1   :  { %1259 = vmatprep.subr.bf16.mxu0 %v1504_v27 }
  0xa2   :  { %1278 = vmatpush3.bf16.msra.mxu1 %v1376_v40 }
  0xa3   :  { %1279 = vmatprep.subr.bf16.mxu1 %v1504_v27 }
  0xa4   :  { %1260 = vmatpush3.bf16.msra.mxu0 %v1369_v33 }
  0xa5   :  { %1261 = vmatprep.subr.bf16.mxu0 %v1504_v27 }
  0xa6   :  { %1280 = vmatpush3.bf16.msra.mxu1 %v1377_v4 }
  0xa7   :  { %1281 = vmatprep.subr.bf16.mxu1 %v1504_v27 }
  0xa8   :  { %1262 = vmatpush3.bf16.msra.mxu0 %v1370_v34 }
  0xaa   :  { %1282 = vmatpush3.bf16.msra.mxu1 %v1378_v5 }
 0x13e   :  { %v1157_v41 = vpop.f32.mrb[0].mxu0 }
 0x13f   :  { %v1158_v43 = vpop.f32.mrb[1].mxu0  ;;  %v1179_v44 = vpop.f32.mrb[0].mxu1 }
 0x140   :  { %v1159_v45 = vadd.f32 %v1158_v43, %v1157_v41  ;;  %v1160_v46 = vpop.f32.mrb[2].mxu0  ;;  %v1180_v47 = vpop.f32.mrb[1].mxu1 }
 0x141   :  { %v1161_v48 = vpop.f32.mrb[3].mxu0  ;;  %v1181_v50 = vadd.f32 %v1180_v47, %v1179_v44  ;;  %v1182_v51 = vpop.f32.mrb[2].mxu1 }
 0x142   :  { %v689_v49 = vadd.f32 %v1159_v45, %v1058_v42  ;;  %v1183_v52 = vpop.f32.mrb[3].mxu1 }
 0x144   :  { %v729_v53 = vadd.f32 %v1181_v50, %v689_v49 }
 0x15e   :  { %v1201_v54 = vpop.f32.mrb[4].mxu0 }
 0x15f   :  { %v1202_v55 = vpop.f32.mrb[5].mxu0  ;;  %v1223_v56 = vpop.f32.mrb[4].mxu1 }
 0x160   :  { %v1203_v57 = vadd.f32 %v1202_v55, %v1201_v54  ;;  %v1204_v58 = vpop.f32.mrb[6].mxu0  ;;  %v1224_v59 = vpop.f32.mrb[5].mxu1 }
 0x161   :  { %v1205_v60 = vpop.f32.mrb[7].mxu0  ;;  %v1225_v62 = vadd.f32 %v1224_v59, %v1223_v56  ;;  %v1226_v63 = vpop.f32.mrb[6].mxu1 }
 0x162   :  { %v769_v61 = vadd.f32 %v1203_v57, %v729_v53  ;;  %v1227_v0 = vpop.f32.mrb[7].mxu1 }
 0x164   :  { %v809_v1 = vadd.f32 %v1225_v62, %v769_v61 }
 0x166   :  { %v814_v2 = vmax.f32 %v809_v1, 0.0 }
 0x168   :  { %v815_v3 = vpack.c.bf16 %v814_v2, %v814_v2 }
 0x16a   :  { %1264 = vmatmul.mubr.bf16.vlgmr.msra.gmra.mrb[8].mxu0 %v815_v3 }
 0x23d   :  { %v921_v7 = vpop.f32.mrb[8].mxu0 }
 0x23e   :  { %v922_v8 = vadd.f32 %v1123_v6, %v921_v7  ;;  %v1265_v9 = vpop.f32.mrb[9].mxu0 }
 0x23f   :  { %v924_v10 = vpop.f32.mrb[10].mxu0 }
 0x240   :  { %v927_v11 = vmax.f32 %v922_v8, 0.0  ;;  %v1266_v12 = vpop.f32.mrb[11].mxu0 }
 0x242   :  { %v928_v13 = vpack.c.bf16 %v927_v11, %v927_v11 }
 0x244   :  { %1284 = vmatmul.mubr.bf16.vlgmr.msra.gmra.mrb[8].mxu1 %v928_v13 }
 0x317   :  { %v1034_v15 = vpop.f32.mrb[8].mxu1 }
 0x318   :  { %v1035_v16 = vadd.f32 %v1132_v14, %v1034_v15  ;;  %v1285_v17 = vpop.f32.mrb[9].mxu1 }
 0x319   :  { %v1037_v18 = vpop.f32.mrb[10].mxu1 }
 0x31a   :  { %1040 = vst [vmem:[#allocation10] sm:$0x3] %v1035_v16  ;;  %v1286_v19 = vpop.f32.mrb[11].mxu1 }
 0x31b   :  { %1478 = shalt.err (!%p1475_p8)
}
 0x31c   :  { %s1479_s6 = scalar_lea.hbm %s1656_s7, 32 }
 0x31d   :  { %p1480_p9 = scmp.ne.s32.totalorder %s1656_s7, %s1479_s6  ;;  %p1483_p10 = scmp.lt.u32.totalorder %s1479_s6, %s1656_s7 }
 0x31f   :  { %p1485_p11 = pnand %p1483_p10, %p1480_p9 }
 0x321   :  { %1488 = shalt.err (!%p1485_p11)
}
 0x322   :  { %1050 = dma.vmem_to_hbm [thread:$0]  %s1048_s29, 32, %s1656_s7, [#allocation4]  }
 0x323   :  { %1495 = dma.done.wait [#allocation4], 32  }
 0x324   :  { %1496 = vsyncadd [#allocation4], 4294967264 }
 0x325   :  { %1054 = vsyncpa [#allocation3], 1 }
 0x326   :  { %1055 = vsyncpa [#allocation6], 1 }
 0x327   :  { %1056 = vsyncpa [#allocation9], 1 }
 0x328   :  { %1057 = vsyncpa [#allocation4], 1 }

</bundles_post_ra>
